<compile_context>
chip_gen: v7x
topology: tpu7x:2x2x1
jax: 0.10.0
libtpu: 0.0.40
codegen_flags: <defaults>
</compile_context>

<pallas_src>
import jax
import jax.numpy as jnp
from jax.experimental import pallas as pl
from jax.experimental.pallas import tpu as pltpu

HID1, HID2, HID3, OUT = 32, 64, 32, 2
_LANE = 128


def _round_up(n, m):
    return ((n + m - 1) // m) * m


def _net_kernel(x_ref,
                w1_ref, b1_ref,
                w2_ref, b2_ref,
                w3_ref, b3_ref,
                w4_ref, b4_ref,
                o_ref):
    def dense(h, w_ref, b_ref):
        # bf16 (or f32) MXU operands, f32 accumulation, f32 bias add.
        return jnp.dot(h.astype(w_ref.dtype), w_ref[...],
                       preferred_element_type=jnp.float32) + b_ref[...]

    x = x_ref[...]

    # layer1 + ReLU   (dropout: eval-mode identity)
    h = jnp.maximum(dense(x, w1_ref, b1_ref), 0.0)
    # layer2 + ReLU   (dropout: eval-mode identity)
    h = jnp.maximum(dense(h, w2_ref, b2_ref), 0.0)
    # layer3 + ReLU
    h = jnp.maximum(dense(h, w3_ref, b3_ref), 0.0)
    # layer4 + sigmoid (exp + reciprocal on the EUP)
    probs = jax.nn.sigmoid(dense(h, w4_ref, b4_ref))        # (tile, OUT) f32

    # Lane-dense store: write (OUT, tile) so the 2-wide output is a dense vst
    # along the 128-lane axis instead of a masked 2/128-lane store.
    o_ref[...] = probs.T.astype(o_ref.dtype)


def _choose_tile(batch, batch_tile, input_dim, elt_bytes,
                 vmem_budget_bytes=40 << 20):
    """Pick a batch tile that is a multiple of 128, keeps >=2 grid steps when
    possible (v7x megacore), and fits the double-buffered VMEM budget."""
    tile = max(_LANE, _round_up(min(batch_tile, _round_up(batch, _LANE)), _LANE))
    b_pad = _round_up(batch, _LANE)

    # keep >= 2 grid steps so v7x's 2 TensorCores both get work
    if b_pad // tile < 2 and b_pad >= 2 * _LANE:
        tile = _round_up((b_pad + 1) // 2, _LANE)

    # shrink if the double-buffered x / out tiles would not fit VMEM
    # (matters for very large input_dim; v5e default scoped VMEM is 16 MiB).
    def _need(t):
        return 2 * t * input_dim * elt_bytes + 2 * OUT * t * 4

    while tile > _LANE and _need(tile) > vmem_budget_bytes:
        tile = max(_LANE, _round_up(tile // 2, _LANE))

    b_pad = _round_up(batch, tile)
    return tile, b_pad


def net_forward(x, params, *, batch_tile=512, compute_dtype=jnp.bfloat16):
    """x: (B, input_dim) float32.  params: dict of transposed weights/biases."""
    B, input_dim = x.shape
    elt = jnp.dtype(compute_dtype).itemsize

    tile, b_pad = _choose_tile(B, batch_tile, input_dim, elt)
    grid = (b_pad // tile,)

    # Cast x / weights to the MXU compute dtype at the boundary; biases stay f32.
    x_c = x.astype(compute_dtype)
    if b_pad != B:
        x_c = jnp.pad(x_c, ((0, b_pad - B), (0, 0)))
    ws = [params[f"w{i}"].astype(compute_dtype) for i in range(1, 5)]
    bs = [params[f"b{i}"].astype(jnp.float32) for i in range(1, 5)]

    x_spec = pl.BlockSpec((tile, input_dim), lambda i: (i, 0))
    o_spec = pl.BlockSpec((OUT, tile), lambda i: (0, i))       # lane-dense

    def full(shape):
        return pl.BlockSpec(shape, lambda i: (0, 0))           # replicated

    in_specs = [x_spec]
    for w, b in zip(ws, bs):
        in_specs += [full(w.shape), full(b.shape)]

    # Explicit VMEM limit: double-buffered x/out tiles + replicated params + margin.
    param_bytes = sum(int(a.size) * a.dtype.itemsize for a in (*ws, *bs))
    need = (2 * tile * input_dim * elt          # double-buffered x tile
            + 2 * OUT * tile * 4                # double-buffered out tile (f32)
            + 2 * param_bytes                   # weights / biases
            + (2 << 20))                        # scratch margin
    vmem_limit = int(min(64 << 20, max(need, 16 << 20)))

    out_t = pl.pallas_call(
        _net_kernel,
        out_shape=jax.ShapeDtypeStruct((OUT, b_pad), jnp.float32),
        grid_spec=pltpu.PrefetchScalarGridSpec(
            num_scalar_prefetch=0,
            grid=grid,
            in_specs=in_specs,
            out_specs=o_spec,
        ),
        compiler_params=pltpu.CompilerParams(
            dimension_semantics=("parallel",),
            vmem_limit_bytes=vmem_limit),
    )(x_c, ws[0], bs[0], ws[1], bs[1], ws[2], bs[2], ws[3], bs[3])

    # (OUT, B_pad) -> (B, OUT), dropping the zero-padded rows.
    return out_t.T[:B]


def init_params(key, input_dim):
    """Deterministic init mimicking nn.Linear default (uniform +-1/sqrt(fan_in)).
    Weights are stored transposed: (in, out)."""
    dims = [(input_dim, HID1), (HID1, HID2), (HID2, HID3), (HID3, OUT)]
    params = {}
    for idx, (fan_in, fan_out) in enumerate(dims, start=1):
        key, kw, kb = jax.random.split(key, 3)
        bound = 1.0 / jnp.sqrt(jnp.float32(fan_in))
        params[f"w{idx}"] = jax.random.uniform(
            kw, (fan_in, fan_out), jnp.float32, minval=-bound, maxval=bound)
        params[f"b{idx}"] = jax.random.uniform(
            kb, (1, fan_out), jnp.float32, minval=-bound, maxval=bound)
    return params


def _reference_forward(x, params, compute_dtype=jnp.bfloat16):
    """Pure-JAX reference using the same bf16-operand / f32-accumulate matmuls."""
    def dense(h, w, b):
        return jnp.dot(h.astype(compute_dtype), w.astype(compute_dtype),
                       preferred_element_type=jnp.float32) + b
    h = jnp.maximum(dense(x, params["w1"], params["b1"]), 0.0)
    h = jnp.maximum(dense(h, params["w2"], params["b2"]), 0.0)
    h = jnp.maximum(dense(h, params["w3"], params["b3"]), 0.0)
    return jax.nn.sigmoid(dense(h, params["w4"], params["b4"]))


if __name__ == "__main__":
    key = jax.random.PRNGKey(0)
    k_x, k_p, k_x2 = jax.random.split(key, 3)

    batch, input_dim = 8, 16
    x = jax.random.normal(k_x, (batch, input_dim), jnp.float32)
    params = init_params(k_p, input_dim)

    out = jax.block_until_ready(net_forward(x, params))
    ref = _reference_forward(x, params)
    assert out.shape == (batch, OUT)
    assert jnp.allclose(out, ref, atol=2e-3, rtol=2e-3), "mismatch vs JAX reference"

    # Second check: non-multiple batch exercising padding + multi-tile grid.
    batch2 = 384
    x2 = jax.random.normal(k_x2, (batch2, input_dim), jnp.float32)
    out2 = jax.block_until_ready(net_forward(x2, params))
    ref2 = _reference_forward(x2, params)
    assert out2.shape == (batch2, OUT)
    assert jnp.allclose(out2, ref2, atol=2e-3, rtol=2e-3), "mismatch (multi-tile)"

    print("KERNEL_OK")
</pallas_src>

<mosaic_0001>
module attributes {stable_mosaic.version = 11 : i64} {
  func.func @_net_kernel(%arg0: i32, %arg1: memref<128x16xbf16, #tpu.memory_space<vmem>>, %arg2: memref<16x32xbf16, #tpu.memory_space<vmem>>, %arg3: memref<1x32xf32, #tpu.memory_space<vmem>>, %arg4: memref<32x64xbf16, #tpu.memory_space<vmem>>, %arg5: memref<1x64xf32, #tpu.memory_space<vmem>>, %arg6: memref<64x32xbf16, #tpu.memory_space<vmem>>, %arg7: memref<1x32xf32, #tpu.memory_space<vmem>>, %arg8: memref<32x2xbf16, #tpu.memory_space<vmem>>, %arg9: memref<1x2xf32, #tpu.memory_space<vmem>>, %arg10: memref<2x128xf32, #tpu.memory_space<vmem>>) attributes {dimension_semantics = [#tpu.dimension_semantics<parallel>], iteration_bounds = array<i64: 1>, scalar_prefetch = 0 : i64, scratch_operands = 0 : i64, tpu.core_type = #tpu.core_type<tc>, window_params = [{transform_indices = @transform_0, window_bounds = array<i64: 128, 16>}, {pipeline_mode = #tpu.pipeline_mode<synchronous>, transform_indices = @transform_1, window_bounds = array<i64: 16, 32>}, {pipeline_mode = #tpu.pipeline_mode<synchronous>, transform_indices = @transform_2, window_bounds = array<i64: 1, 32>}, {pipeline_mode = #tpu.pipeline_mode<synchronous>, transform_indices = @transform_3, window_bounds = array<i64: 32, 64>}, {pipeline_mode = #tpu.pipeline_mode<synchronous>, transform_indices = @transform_4, window_bounds = array<i64: 1, 64>}, {pipeline_mode = #tpu.pipeline_mode<synchronous>, transform_indices = @transform_5, window_bounds = array<i64: 64, 32>}, {pipeline_mode = #tpu.pipeline_mode<synchronous>, transform_indices = @transform_6, window_bounds = array<i64: 1, 32>}, {pipeline_mode = #tpu.pipeline_mode<synchronous>, transform_indices = @transform_7, window_bounds = array<i64: 32, 2>}, {pipeline_mode = #tpu.pipeline_mode<synchronous>, transform_indices = @transform_8, window_bounds = array<i64: 1, 2>}, {transform_indices = @transform_9, window_bounds = array<i64: 2, 128>}]} {
    %c0 = arith.constant 0 : index
    %c0_0 = arith.constant 0 : index
    %0 = vector.load %arg1[%c0, %c0_0] : memref<128x16xbf16, #tpu.memory_space<vmem>>, vector<128x16xbf16>
    %c0_1 = arith.constant 0 : index
    %c0_2 = arith.constant 0 : index
    %1 = vector.load %arg2[%c0_1, %c0_2] : memref<16x32xbf16, #tpu.memory_space<vmem>>, vector<16x32xbf16>
    %cst = arith.constant dense<0.000000e+00> : vector<128x32xf32>
    %2 = tpu.matmul %0, %1, %cst {dimension_numbers = #tpu.dot_dimension_numbers<[1], [0], [0], [1], [0, 0, 1, 1], [], []>} : vector<128x16xbf16>, vector<16x32xbf16>, vector<128x32xf32> -> vector<128x32xf32>
    %c0_3 = arith.constant 0 : index
    %c0_4 = arith.constant 0 : index
    %3 = vector.load %arg3[%c0_3, %c0_4] : memref<1x32xf32, #tpu.memory_space<vmem>>, vector<1x32xf32>
    %4 = vector.broadcast %3 : vector<1x32xf32> to vector<128x32xf32>
    %5 = arith.addf %2, %4 : vector<128x32xf32>
    %cst_5 = arith.constant 0.000000e+00 : f32
    %6 = vector.broadcast %cst_5 : f32 to vector<128x32xf32>
    %7 = arith.maximumf %5, %6 : vector<128x32xf32>
    %8 = arith.truncf %7 : vector<128x32xf32> to vector<128x32xbf16>
    %c0_6 = arith.constant 0 : index
    %c0_7 = arith.constant 0 : index
    %9 = vector.load %arg4[%c0_6, %c0_7] : memref<32x64xbf16, #tpu.memory_space<vmem>>, vector<32x64xbf16>
    %cst_8 = arith.constant dense<0.000000e+00> : vector<128x64xf32>
    %10 = tpu.matmul %8, %9, %cst_8 {dimension_numbers = #tpu.dot_dimension_numbers<[1], [0], [0], [1], [0, 0, 1, 1], [], []>} : vector<128x32xbf16>, vector<32x64xbf16>, vector<128x64xf32> -> vector<128x64xf32>
    %c0_9 = arith.constant 0 : index
    %c0_10 = arith.constant 0 : index
    %11 = vector.load %arg5[%c0_9, %c0_10] : memref<1x64xf32, #tpu.memory_space<vmem>>, vector<1x64xf32>
    %12 = vector.broadcast %11 : vector<1x64xf32> to vector<128x64xf32>
    %13 = arith.addf %10, %12 : vector<128x64xf32>
    %cst_11 = arith.constant 0.000000e+00 : f32
    %14 = vector.broadcast %cst_11 : f32 to vector<128x64xf32>
    %15 = arith.maximumf %13, %14 : vector<128x64xf32>
    %16 = arith.truncf %15 : vector<128x64xf32> to vector<128x64xbf16>
    %c0_12 = arith.constant 0 : index
    %c0_13 = arith.constant 0 : index
    %17 = vector.load %arg6[%c0_12, %c0_13] : memref<64x32xbf16, #tpu.memory_space<vmem>>, vector<64x32xbf16>
    %cst_14 = arith.constant dense<0.000000e+00> : vector<128x32xf32>
    %18 = tpu.matmul %16, %17, %cst_14 {dimension_numbers = #tpu.dot_dimension_numbers<[1], [0], [0], [1], [0, 0, 1, 1], [], []>} : vector<128x64xbf16>, vector<64x32xbf16>, vector<128x32xf32> -> vector<128x32xf32>
    %c0_15 = arith.constant 0 : index
    %c0_16 = arith.constant 0 : index
    %19 = vector.load %arg7[%c0_15, %c0_16] : memref<1x32xf32, #tpu.memory_space<vmem>>, vector<1x32xf32>
    %20 = vector.broadcast %19 : vector<1x32xf32> to vector<128x32xf32>
    %21 = arith.addf %18, %20 : vector<128x32xf32>
    %cst_17 = arith.constant 0.000000e+00 : f32
    %22 = vector.broadcast %cst_17 : f32 to vector<128x32xf32>
    %23 = arith.maximumf %21, %22 : vector<128x32xf32>
    %24 = arith.truncf %23 : vector<128x32xf32> to vector<128x32xbf16>
    %c0_18 = arith.constant 0 : index
    %c0_19 = arith.constant 0 : index
    %25 = vector.load %arg8[%c0_18, %c0_19] : memref<32x2xbf16, #tpu.memory_space<vmem>>, vector<32x2xbf16>
    %cst_20 = arith.constant dense<0.000000e+00> : vector<128x2xf32>
    %26 = tpu.matmul %24, %25, %cst_20 {dimension_numbers = #tpu.dot_dimension_numbers<[1], [0], [0], [1], [0, 0, 1, 1], [], []>} : vector<128x32xbf16>, vector<32x2xbf16>, vector<128x2xf32> -> vector<128x2xf32>
    %c0_21 = arith.constant 0 : index
    %c0_22 = arith.constant 0 : index
    %27 = vector.load %arg9[%c0_21, %c0_22] : memref<1x2xf32, #tpu.memory_space<vmem>>, vector<1x2xf32>
    %28 = vector.broadcast %27 : vector<1x2xf32> to vector<128x2xf32>
    %29 = arith.addf %26, %28 : vector<128x2xf32>
    %30 = arith.negf %29 : vector<128x2xf32>
    %31 = math.exp %30 : vector<128x2xf32>
    %cst_23 = arith.constant 1.000000e+00 : f32
    %32 = vector.broadcast %cst_23 : f32 to vector<128x2xf32>
    %33 = arith.addf %32, %31 : vector<128x2xf32>
    %34 = arith.divf %32, %33 : vector<128x2xf32>
    %35 = tpu.transpose %34, [1, 0] : vector<128x2xf32> -> vector<2x128xf32>
    %c0_24 = arith.constant 0 : index
    %c0_25 = arith.constant 0 : index
    %36 = vector.load %arg10[%c0_24, %c0_25] : memref<2x128xf32, #tpu.memory_space<vmem>>, vector<2x128xf32>
    tpu.vector_store %arg10[%c0_24, %c0_25], %35 {strides = array<i32>} : memref<2x128xf32, #tpu.memory_space<vmem>>, vector<2x128xf32>,
    return
  }
  func.func @transform_0(%arg0: i32) -> (i32, i32) {
    %c0_i32 = arith.constant 0 : i32
    %c0_i32_0 = arith.constant 0 : i32
    return %arg0, %c0_i32 : i32, i32
  }
  func.func @transform_1(%arg0: i32) -> (i32, i32) {
    %c0_i32 = arith.constant 0 : i32
    %c0_i32_0 = arith.constant 0 : i32
    %c0_i32_1 = arith.constant 0 : i32
    return %c0_i32, %c0_i32_0 : i32, i32
  }
  func.func @transform_2(%arg0: i32) -> (i32, i32) {
    %c0_i32 = arith.constant 0 : i32
    %c0_i32_0 = arith.constant 0 : i32
    %c0_i32_1 = arith.constant 0 : i32
    return %c0_i32, %c0_i32_0 : i32, i32
  }
  func.func @transform_3(%arg0: i32) -> (i32, i32) {
    %c0_i32 = arith.constant 0 : i32
    %c0_i32_0 = arith.constant 0 : i32
    %c0_i32_1 = arith.constant 0 : i32
    return %c0_i32, %c0_i32_0 : i32, i32
  }
  func.func @transform_4(%arg0: i32) -> (i32, i32) {
    %c0_i32 = arith.constant 0 : i32
    %c0_i32_0 = arith.constant 0 : i32
    %c0_i32_1 = arith.constant 0 : i32
    return %c0_i32, %c0_i32_0 : i32, i32
  }
  func.func @transform_5(%arg0: i32) -> (i32, i32) {
    %c0_i32 = arith.constant 0 : i32
    %c0_i32_0 = arith.constant 0 : i32
    %c0_i32_1 = arith.constant 0 : i32
    return %c0_i32, %c0_i32_0 : i32, i32
  }
  func.func @transform_6(%arg0: i32) -> (i32, i32) {
    %c0_i32 = arith.constant 0 : i32
    %c0_i32_0 = arith.constant 0 : i32
    %c0_i32_1 = arith.constant 0 : i32
    return %c0_i32, %c0_i32_0 : i32, i32
  }
  func.func @transform_7(%arg0: i32) -> (i32, i32) {
    %c0_i32 = arith.constant 0 : i32
    %c0_i32_0 = arith.constant 0 : i32
    %c0_i32_1 = arith.constant 0 : i32
    return %c0_i32, %c0_i32_0 : i32, i32
  }
  func.func @transform_8(%arg0: i32) -> (i32, i32) {
    %c0_i32 = arith.constant 0 : i32
    %c0_i32_0 = arith.constant 0 : i32
    %c0_i32_1 = arith.constant 0 : i32
    return %c0_i32, %c0_i32_0 : i32, i32
  }
  func.func @transform_9(%arg0: i32) -> (i32, i32) {
    %c0_i32 = arith.constant 0 : i32
    %c0_i32_0 = arith.constant 0 : i32
    return %c0_i32, %arg0 : i32, i32
  }
}

</mosaic_0001>

<bundles_post_ra>
// kernel: tpu_custom_call.1
= control target key start
LH: loop header
LB: loop body
LE: loop exit
PB: predicated region body
PF: predicated region fallthrough
CT: control target
= control target key end

     0   :  { %vm105_vm0 = vcmask 130048   ;;  %s1366_s0 = inlined_call_operand.vmem [shape: bf16[128,16], index: 0, kind: input, shape index: {}]   ;;  %s1367_s1 = inlined_call_operand.vmem [shape: bf16[16,32], index: 1, kind: input, shape index: {}]   ;;  %s1368_s2 = inlined_call_operand.vmem [shape: f32[1,32], index: 2, kind: input, shape index: {}]   ;;  %s1369_s3 = inlined_call_operand.vmem [shape: bf16[32,64], index: 3, kind: input, shape index: {}]   ;;  %s1370_s4 = inlined_call_operand.vmem [shape: f32[1,64], index: 4, kind: input, shape index: {}]   ;;  %s1371_s5 = inlined_call_operand.vmem [shape: bf16[64,32], index: 5, kind: input, shape index: {}]   ;;  %s1372_s6 = inlined_call_operand.vmem [shape: f32[1,32], index: 6, kind: input, shape index: {}]   ;;  %s1373_s7 = inlined_call_operand.vmem [shape: bf16[32,2], index: 7, kind: input, shape index: {}]   ;;  %s1374_s8 = inlined_call_operand.vmem [shape: f32[1,2], index: 8, kind: input, shape index: {}]   ;;  %s1375_s9 = inlined_call_operand.hbm [shape: f32[2,128], index: 9, kind: output, shape index: {}]  }
   0x1   :  { %v1085_v0 = vld [vmem:[%s1367_s1] sm:$0xff]   ;;  %v1087_v2 = vld [vmem:[%s1366_s0 + $0x8] sm:$0xff]   ;;  %v1088_v3 = vld [vmem:[%s1366_s0 + $0x10] sm:$0xff]  }
   0x2   :  { %v1086_v1 = vld [vmem:[%s1366_s0] sm:$0xff]   ;;  %1002 = vmatprep.subr.bf16.mxu0 %v1085_v0  ;;  %v1089_v4 = vld [vmem:[%s1366_s0 + $0x18] sm:$0xff]  }
   0x3   :  { %1003 = vmatpush3.bf16.msra.mxu0 %v1085_v0  ;;  %1004 = vmatprep.mubr.msk.bf16.mxu0 %vm105_vm0, %v1086_v1  ;;  %v1090_v5 = vld [vmem:[%s1366_s0 + $0x20] sm:$0xff]  }
   0x6   :  { %1005 = vmatmul.mubr.msk.bf16.vlgmr.msra.gmra.mrb[0].mxu0 %vm105_vm0, %v1087_v2 }
   0x7   :  { %1008 = vmatprep.mubr.msk.bf16.mxu0 %vm105_vm0, %v1088_v3 }
   0xe   :  { %1009 = vmatmul.mubr.msk.bf16.gmra.mrb[4].mxu0 %vm105_vm0, %v1089_v4 }
   0xf   :  { %14 = vsyncpa [#allocation3], 0  ;;  %1012 = vmatprep.mubr.msk.bf16.mxu0 %vm105_vm0, %v1090_v5  ;;  %v1091_v6 = vld [vmem:[%s1366_s0 + $0x28] sm:$0xff]   ;;  %v1092_v7 = vld [vmem:[%s1366_s0 + $0x30] sm:$0xff]   ;;  %vm274_vm1 = vcmask 261120   ;;  %vm459_vm2 = vcmask 523264  }
  0x10   :  { %v1093_v8 = vld [vmem:[%s1366_s0 + $0x38] sm:$0xff]   ;;  %v1094_v9 = vld [vmem:[%s1369_s3] sm:$0xff]   ;;  %v1095_v10 = vld [vmem:[%s1369_s3 + $0x8] sm:$0xff]  }
  0x11   :  { %1020 = vmatprep.subr.bf16.mxu1 %v1094_v9  ;;  %v1096_v11 = vld [vmem:[%s1371_s5] sm:$0xff]   ;;  %v1097_v12 = vld [vmem:[%s1371_s5 + $0x8] sm:$0xff]   ;;  %v1098_v13 = vld [vmem:[%s1371_s5 + $0x10] sm:$0xff]  }
  0x12   :  { %1021 = vmatpush3.bf16.msra.mxu1 %v1094_v9  ;;  %1040 = vmatprep.subr.bf16.mxu0 %v1096_v11  ;;  %v892_v14 = vld [vmem:[%s1368_s2] ss:$0 sm:$0xff]  ;;  %v1101_v9 = vld [vmem:[%s1373_s7 + $0x8] sm:$0xff]  }
  0x13   :  { %1022 = vmatprep.subr.bf16.mxu1 %v1095_v10  ;;  %1041 = vmatpush3.bf16.msra.mxu0 %v1096_v11 }
  0x14   :  { %1042 = vmatprep.subr.bf16.mxu0 %v1097_v12 }
  0x16   :  { %1013 = vmatmul.mubr.msk.bf16.gmra.mrb[8].mxu0 %vm105_vm0, %v1091_v6  ;;  %1023 = vmatpush3.bf16.msra.mxu1 %v1095_v10  ;;  %v910_v10 = vld [vmem:[%s1370_s4] ss:$0 sm:$0xff] }
  0x17   :  { %1016 = vmatprep.mubr.msk.bf16.mxu0 %vm105_vm0, %v1092_v7  ;;  %1043 = vmatpush3.bf16.msra.mxu0 %v1097_v12  ;;  %v1099_v7 = vld [vmem:[%s1371_s5 + $0x18] sm:$0xff]  }
  0x18   :  { %1044 = vmatprep.subr.bf16.mxu0 %v1098_v13 }
  0x1b   :  { %1045 = vmatpush3.bf16.msra.mxu0 %v1098_v13 }
  0x1c   :  { %1046 = vmatprep.subr.bf16.mxu0 %v1099_v7 }
  0x1e   :  { %1017 = vmatmul.mubr.msk.bf16.gmra.mrb[12].mxu0 %vm105_vm0, %v1093_v8  ;;  %v1100_v8 = vld [vmem:[%s1373_s7] sm:$0xff]  }
  0x1f   :  { %1047 = vmatpush3.bf16.msra.mxu0 %v1099_v7  ;;  %1064 = vmatprep.subr.bf16.mxu1 %v1100_v8 }
  0xd9   :  { %v1006_v15 = vpop.f32.mrb[0].mxu0 }
  0xda   :  { %v173_v16 = vadd.f32 %v1006_v15, %v892_v14  ;;  %v164_v17 = vpop.f32.mrb[1].mxu0 }
  0xdb   :  { %v165_v18 = vadd.f32 %v892_v14, %v164_v17  ;;  %v1007_v19 = vpop.f32.mrb[2].mxu0 }
  0xdc   :  { %v176_v20 = vadd.f32 %v1007_v19, %v892_v14  ;;  %v167_v21 = vpop.f32.mrb[3].mxu0  ;;  %v229_v23 = vmax.f32 %v173_v16, 0.0 }
  0xdd   :  { %v168_v22 = vadd.f32 %v892_v14, %v167_v21  ;;  %v227_v25 = vmax.f32 %v165_v18, 0.0 }
  0xde   :  { %v230_v24 = vmax.f32 %v176_v20, 0.0 }
  0xdf   :  { %v228_v26 = vmax.f32 %v168_v22, 0.0 }
  0xe0   :  { %v244_v27 = vpack.c.bf16 %v230_v24, %v229_v23 }
  0xe1   :  { %v1010_v28 = vpop.f32.mrb[4].mxu0  ;;  %v243_v29 = vpack.c.bf16 %v228_v26, %v227_v25 }
  0xe2   :  { %v189_v30 = vadd.f32 %v1010_v28, %v892_v14  ;;  %v180_v31 = vpop.f32.mrb[5].mxu0 }
  0xe3   :  { %v181_v32 = vadd.f32 %v892_v14, %v180_v31  ;;  %v1011_v33 = vpop.f32.mrb[6].mxu0  ;;  %1024 = vmatprep.mubr.msk.bf16.mxu1 %vm274_vm1, %v243_v29 }
  0xe4   :  { %v233_v34 = vmax.f32 %v189_v30, 0.0  ;;  %v192_v35 = vadd.f32 %v1011_v33, %v892_v14  ;;  %v183_v36 = vpop.f32.mrb[7].mxu0  ;;  %1025 = vmatmul.mubr.msk.bf16.vlgmr.msra.gmra.mrb[0].mxu1 %vm274_vm1, %v244_v27 }
  0xe5   :  { %v231_v37 = vmax.f32 %v181_v32, 0.0  ;;  %v184_v38 = vadd.f32 %v892_v14, %v183_v36  ;;  %1065 = vmatpush3.bf16.msra.mxu1 %v1100_v8 }
  0xe6   :  { %v234_v39 = vmax.f32 %v192_v35, 0.0  ;;  %1066 = vmatprep.subr.bf16.mxu1 %v1101_v9 }
  0xe7   :  { %v232_v40 = vmax.f32 %v184_v38, 0.0 }
  0xe8   :  { %v246_v41 = vpack.c.bf16 %v234_v39, %v233_v34 }
  0xe9   :  { %v245_v42 = vpack.c.bf16 %v232_v40, %v231_v37  ;;  %v1014_v43 = vpop.f32.mrb[8].mxu0  ;;  %1067 = vmatpush3.bf16.msra.mxu1 %v1101_v9 }
  0xea   :  { %v205_v44 = vadd.f32 %v1014_v43, %v892_v14  ;;  %v196_v45 = vpop.f32.mrb[9].mxu0 }
  0xeb   :  { %v197_v46 = vadd.f32 %v892_v14, %v196_v45  ;;  %1028 = vmatprep.mubr.msk.bf16.mxu1 %vm274_vm1, %v245_v42  ;;  %v1015_v47 = vpop.f32.mrb[10].mxu0 }
  0xec   :  { %v237_v48 = vmax.f32 %v205_v44, 0.0  ;;  %v208_v49 = vadd.f32 %v1015_v47, %v892_v14  ;;  %1029 = vmatmul.mubr.msk.bf16.gmra.mrb[4].mxu1 %vm274_vm1, %v246_v41  ;;  %v199_v50 = vpop.f32.mrb[11].mxu0 }
  0xed   :  { %v235_v51 = vmax.f32 %v197_v46, 0.0  ;;  %v200_v52 = vadd.f32 %v892_v14, %v199_v50 }
  0xee   :  { %v238_v53 = vmax.f32 %v208_v49, 0.0 }
  0xef   :  { %v236_v54 = vmax.f32 %v200_v52, 0.0 }
  0xf0   :  { %v248_v55 = vpack.c.bf16 %v238_v53, %v237_v48 }
  0xf1   :  { %v247_v56 = vpack.c.bf16 %v236_v54, %v235_v51  ;;  %v1018_v57 = vpop.f32.mrb[12].mxu0 }
  0xf2   :  { %v221_v58 = vadd.f32 %v1018_v57, %v892_v14  ;;  %v212_v59 = vpop.f32.mrb[13].mxu0 }
  0xf3   :  { %1032 = vmatprep.mubr.msk.bf16.mxu1 %vm274_vm1, %v247_v56  ;;  %v213_v60 = vadd.f32 %v892_v14, %v212_v59  ;;  %v1019_v61 = vpop.f32.mrb[14].mxu0 }
  0xf4   :  { %1033 = vmatmul.mubr.msk.bf16.gmra.mrb[8].mxu1 %vm274_vm1, %v248_v55  ;;  %v241_v62 = vmax.f32 %v221_v58, 0.0  ;;  %v224_v63 = vadd.f32 %v1019_v61, %v892_v14  ;;  %v215_v0 = vpop.f32.mrb[15].mxu0 }
  0xf5   :  { %v239_v1 = vmax.f32 %v213_v60, 0.0  ;;  %v216_v2 = vadd.f32 %v892_v14, %v215_v0 }
  0xf6   :  { %v242_v3 = vmax.f32 %v224_v63, 0.0 }
  0xf7   :  { %v240_v4 = vmax.f32 %v216_v2, 0.0 }
  0xf8   :  { %v250_v5 = vpack.c.bf16 %v242_v3, %v241_v62  ;;  %v921_v3 = vld [vmem:[%s1372_s6] ss:$0 sm:$0xff] }
  0xf9   :  { %v249_v6 = vpack.c.bf16 %v240_v4, %v239_v1 }
  0xfb   :  { %1036 = vmatprep.mubr.msk.bf16.mxu1 %vm274_vm1, %v249_v6 }
  0xfc   :  { %1037 = vmatmul.mubr.msk.bf16.gmra.mrb[12].mxu1 %vm274_vm1, %v250_v5 }
 0x1b7   :  { %v1026_v11 = vpop.f32.mrb[0].mxu1 }
 0x1b8   :  { %v342_v12 = vadd.f32 %v1026_v11, %v910_v10  ;;  %v333_v13 = vpop.f32.mrb[1].mxu1 }
 0x1b9   :  { %v334_v14 = vadd.f32 %v910_v10, %v333_v13  ;;  %v1027_v15 = vpop.f32.mrb[2].mxu1 }
 0x1ba   :  { %v345_v16 = vadd.f32 %v1027_v15, %v910_v10  ;;  %v336_v17 = vpop.f32.mrb[3].mxu1  ;;  %v398_v19 = vmax.f32 %v342_v12, 0.0 }
 0x1bb   :  { %v337_v18 = vadd.f32 %v910_v10, %v336_v17  ;;  %v396_v21 = vmax.f32 %v334_v14, 0.0 }
 0x1bc   :  { %v399_v20 = vmax.f32 %v345_v16, 0.0 }
 0x1bd   :  { %v397_v22 = vmax.f32 %v337_v18, 0.0 }
 0x1be   :  { %v413_v23 = vpack.c.bf16 %v399_v20, %v398_v19 }
 0x1bf   :  { %v412_v24 = vpack.c.bf16 %v397_v22, %v396_v21  ;;  %v1030_v25 = vpop.f32.mrb[4].mxu1 }
 0x1c0   :  { %v358_v26 = vadd.f32 %v1030_v25, %v910_v10  ;;  %v349_v27 = vpop.f32.mrb[5].mxu1 }
 0x1c1   :  { %v350_v28 = vadd.f32 %v910_v10, %v349_v27  ;;  %v1031_v29 = vpop.f32.mrb[6].mxu1  ;;  %1048 = vmatprep.mubr.msk.bf16.mxu0 %vm459_vm2, %v412_v24 }
 0x1c2   :  { %v402_v30 = vmax.f32 %v358_v26, 0.0  ;;  %v361_v31 = vadd.f32 %v1031_v29, %v910_v10  ;;  %v352_v32 = vpop.f32.mrb[7].mxu1  ;;  %1049 = vmatmul.mubr.msk.bf16.vlgmr.msra.gmra.mrb[16].mxu0 %vm459_vm2, %v413_v23 }
 0x1c3   :  { %v400_v33 = vmax.f32 %v350_v28, 0.0  ;;  %v353_v34 = vadd.f32 %v910_v10, %v352_v32 }
 0x1c4   :  { %v403_v35 = vmax.f32 %v361_v31, 0.0 }
 0x1c5   :  { %v401_v36 = vmax.f32 %v353_v34, 0.0 }
 0x1c6   :  { %v415_v37 = vpack.c.bf16 %v403_v35, %v402_v30 }
 0x1c7   :  { %v414_v38 = vpack.c.bf16 %v401_v36, %v400_v33  ;;  %v1034_v39 = vpop.f32.mrb[8].mxu1 }
 0x1c8   :  { %v374_v40 = vadd.f32 %v1034_v39, %v910_v10  ;;  %v365_v41 = vpop.f32.mrb[9].mxu1 }
 0x1c9   :  { %v366_v42 = vadd.f32 %v910_v10, %v365_v41  ;;  %1052 = vmatprep.mubr.msk.bf16.mxu0 %vm459_vm2, %v414_v38  ;;  %v1035_v43 = vpop.f32.mrb[10].mxu1 }
 0x1ca   :  { %v406_v44 = vmax.f32 %v374_v40, 0.0  ;;  %v377_v45 = vadd.f32 %v1035_v43, %v910_v10  ;;  %1053 = vmatmul.mubr.msk.bf16.gmra.mrb[20].mxu0 %vm459_vm2, %v415_v37  ;;  %v368_v46 = vpop.f32.mrb[11].mxu1 }
 0x1cb   :  { %v404_v47 = vmax.f32 %v366_v42, 0.0  ;;  %v369_v48 = vadd.f32 %v910_v10, %v368_v46 }
 0x1cc   :  { %v407_v49 = vmax.f32 %v377_v45, 0.0 }
 0x1cd   :  { %v405_v50 = vmax.f32 %v369_v48, 0.0 }
 0x1ce   :  { %v417_v51 = vpack.c.bf16 %v407_v49, %v406_v44 }
 0x1cf   :  { %v416_v52 = vpack.c.bf16 %v405_v50, %v404_v47  ;;  %v1038_v53 = vpop.f32.mrb[12].mxu1 }
 0x1d0   :  { %v390_v54 = vadd.f32 %v1038_v53, %v910_v10  ;;  %v381_v55 = vpop.f32.mrb[13].mxu1 }
 0x1d1   :  { %1056 = vmatprep.mubr.msk.bf16.mxu0 %vm459_vm2, %v416_v52  ;;  %v382_v56 = vadd.f32 %v910_v10, %v381_v55  ;;  %v1039_v57 = vpop.f32.mrb[14].mxu1 }
 0x1d2   :  { %1057 = vmatmul.mubr.msk.bf16.gmra.mrb[24].mxu0 %vm459_vm2, %v417_v51  ;;  %v410_v58 = vmax.f32 %v390_v54, 0.0  ;;  %v393_v59 = vadd.f32 %v1039_v57, %v910_v10  ;;  %v384_v60 = vpop.f32.mrb[15].mxu1 }
 0x1d3   :  { %v408_v61 = vmax.f32 %v382_v56, 0.0  ;;  %v385_v62 = vadd.f32 %v910_v10, %v384_v60  ;;  %v1336_v60 = vld [vmem:[%s1374_s8] ss:$0 sm:$0xff]  ;;  %s1190_s8 = smov [#allocation2]  }
 0x1d4   :  { %v411_v63 = vmax.f32 %v393_v59, 0.0  ;;  %s884_s21 = sshll.u32 %s1190_s8, 4  ;;  %s885_s21 = int_to_ptr.vmem [resolvable:$true] %s884_s21 }
 0x1d5   :  { %v409_v0 = vmax.f32 %v385_v62, 0.0  ;;  %s1166_s22 = scalar_lea.vmem %s885_s21, 32  ;;  %p1171_p1 = scmp.lt.s32.totalorder %s885_s21, %s885_s21 }
 0x1d6   :  { %v419_v1 = vpack.c.bf16 %v411_v63, %v410_v58  ;;  %p1167_p0 = scmp.ne.s32.totalorder %s885_s21, %s1166_s22  ;;  %p1172_p2 = scmp.lt.s32.totalorder %s1166_s22, %s1166_s22 }
 0x1d7   :  { %v418_v2 = vpack.c.bf16 %v409_v0, %v408_v61 }
 0x1d8   :  { %p1173_p3 = por %p1172_p2, %p1171_p1 }
 0x1d9   :  { %1060 = vmatprep.mubr.msk.bf16.mxu0 %vm459_vm2, %v418_v2 }
 0x1da   :  { %1061 = vmatmul.mubr.msk.bf16.gmra.mrb[28].mxu0 %vm459_vm2, %v419_v1  ;;  %p1174_p4 = pnand %p1173_p3, %p1167_p0 }
 0x295   :  { %v1050_v4 = vpop.f32.mrb[16].mxu0 }
 0x296   :  { %v527_v5 = vadd.f32 %v1050_v4, %v921_v3  ;;  %v518_v6 = vpop.f32.mrb[17].mxu0 }
 0x297   :  { %v519_v7 = vadd.f32 %v921_v3, %v518_v6  ;;  %v1051_v8 = vpop.f32.mrb[18].mxu0 }
 0x298   :  { %v530_v9 = vadd.f32 %v1051_v8, %v921_v3  ;;  %v521_v11 = vpop.f32.mrb[19].mxu0  ;;  %v583_v12 = vmax.f32 %v527_v5, 0.0 }
 0x299   :  { %v522_v10 = vadd.f32 %v921_v3, %v521_v11  ;;  %v581_v14 = vmax.f32 %v519_v7, 0.0 }
 0x29a   :  { %v584_v13 = vmax.f32 %v530_v9, 0.0 }
 0x29b   :  { %v582_v15 = vmax.f32 %v522_v10, 0.0 }
 0x29c   :  { %v598_v16 = vpack.c.bf16 %v584_v13, %v583_v12 }
 0x29d   :  { %v597_v17 = vpack.c.bf16 %v582_v15, %v581_v14  ;;  %v1054_v18 = vpop.f32.mrb[20].mxu0 }
 0x29e   :  { %v543_v19 = vadd.f32 %v1054_v18, %v921_v3  ;;  %v534_v20 = vpop.f32.mrb[21].mxu0 }
 0x29f   :  { %v535_v21 = vadd.f32 %v921_v3, %v534_v20  ;;  %v1055_v22 = vpop.f32.mrb[22].mxu0  ;;  %1068 = vmatprep.mubr.msk.bf16.mxu1 %vm274_vm1, %v597_v17 }
 0x2a0   :  { %v546_v23 = vadd.f32 %v1055_v22, %v921_v3  ;;  %v537_v24 = vpop.f32.mrb[23].mxu0  ;;  %1069 = vmatmul.mubr.msk.bf16.vlgmr.msra.gmra.mrb[16].mxu1 %vm274_vm1, %v598_v16  ;;  %v587_v26 = vmax.f32 %v543_v19, 0.0 }
 0x2a1   :  { %v538_v25 = vadd.f32 %v921_v3, %v537_v24  ;;  %v585_v28 = vmax.f32 %v535_v21, 0.0 }
 0x2a2   :  { %v588_v27 = vmax.f32 %v546_v23, 0.0 }
 0x2a3   :  { %v586_v29 = vmax.f32 %v538_v25, 0.0 }
 0x2a4   :  { %v600_v30 = vpack.c.bf16 %v588_v27, %v587_v26 }
 0x2a5   :  { %v599_v31 = vpack.c.bf16 %v586_v29, %v585_v28  ;;  %v1058_v32 = vpop.f32.mrb[24].mxu0 }
 0x2a6   :  { %v559_v33 = vadd.f32 %v1058_v32, %v921_v3  ;;  %v550_v34 = vpop.f32.mrb[25].mxu0 }
 0x2a7   :  { %v551_v35 = vadd.f32 %v921_v3, %v550_v34  ;;  %1072 = vmatprep.mubr.msk.bf16.mxu1 %vm274_vm1, %v599_v31  ;;  %v1059_v36 = vpop.f32.mrb[26].mxu0 }
 0x2a8   :  { %v591_v37 = vmax.f32 %v559_v33, 0.0  ;;  %v562_v38 = vadd.f32 %v1059_v36, %v921_v3  ;;  %1073 = vmatmul.mubr.msk.bf16.gmra.mrb[20].mxu1 %vm274_vm1, %v600_v30  ;;  %v553_v39 = vpop.f32.mrb[27].mxu0 }
 0x2a9   :  { %v589_v40 = vmax.f32 %v551_v35, 0.0  ;;  %v554_v41 = vadd.f32 %v921_v3, %v553_v39 }
 0x2aa   :  { %v592_v42 = vmax.f32 %v562_v38, 0.0 }
 0x2ab   :  { %v590_v43 = vmax.f32 %v554_v41, 0.0 }
 0x2ac   :  { %v602_v44 = vpack.c.bf16 %v592_v42, %v591_v37 }
 0x2ad   :  { %v601_v45 = vpack.c.bf16 %v590_v43, %v589_v40  ;;  %v1062_v46 = vpop.f32.mrb[28].mxu0 }
 0x2ae   :  { %v575_v47 = vadd.f32 %v1062_v46, %v921_v3  ;;  %v566_v48 = vpop.f32.mrb[29].mxu0 }
 0x2af   :  { %1076 = vmatprep.mubr.msk.bf16.mxu1 %vm274_vm1, %v601_v45  ;;  %v567_v49 = vadd.f32 %v921_v3, %v566_v48  ;;  %v1063_v50 = vpop.f32.mrb[30].mxu0 }
 0x2b0   :  { %1077 = vmatmul.mubr.msk.bf16.gmra.mrb[24].mxu1 %vm274_vm1, %v602_v44  ;;  %v595_v51 = vmax.f32 %v575_v47, 0.0  ;;  %v578_v52 = vadd.f32 %v1063_v50, %v921_v3  ;;  %v569_v53 = vpop.f32.mrb[31].mxu0 }
 0x2b1   :  { %v593_v54 = vmax.f32 %v567_v49, 0.0  ;;  %v570_v55 = vadd.f32 %v921_v3, %v569_v53 }
 0x2b2   :  { %v596_v56 = vmax.f32 %v578_v52, 0.0 }
 0x2b3   :  { %v594_v57 = vmax.f32 %v570_v55, 0.0 }
 0x2b4   :  { %v604_v58 = vpack.c.bf16 %v596_v56, %v595_v51 }
 0x2b5   :  { %v603_v59 = vpack.c.bf16 %v594_v57, %v593_v54 }
 0x2b7   :  { %1080 = vmatprep.mubr.msk.bf16.mxu1 %vm274_vm1, %v603_v59 }
 0x2b8   :  { %1081 = vmatmul.mubr.msk.bf16.gmra.mrb[28].mxu1 %vm274_vm1, %v604_v58 }
 0x373   :  { %v1070_v61 = vpop.f32.mrb[16].mxu1 }
 0x374   :  { %v686_v62 = vpop.f32.mrb[17].mxu1  ;;  %v695_v63 = vadd.f32 %v1070_v61, %v1336_v60 }
 0x375   :  { %v687_v0 = vadd.f32 %v1336_v60, %v686_v62  ;;  %v1071_v1 = vpop.f32.mrb[18].mxu1 }
 0x376   :  { %v689_v2 = vpop.f32.mrb[19].mxu1  ;;  %v947_v5 = vmul.f32 -1.442695, %v695_v63  ;;  %v698_v6 = vadd.f32 %v1071_v1, %v1336_v60 }
 0x377   :  { %v945_v3 = vmul.f32 -1.442695, %v687_v0  ;;  %v690_v4 = vadd.f32 %v1336_v60, %v689_v2 }
 0x378   :  { %v948_v11 = vmul.f32 -1.442695, %v698_v6 }
 0x379   :  { %1102 = vpow2.f32 %v945_v3  ;;  %v946_v7 = vmul.f32 -1.442695, %v690_v4 }
 0x37b   :  { %1104 = vpow2.f32 %v946_v7  ;;  %v1074_v8 = vpop.f32.mrb[20].mxu1 }
 0x37c   :  { %v702_v9 = vpop.f32.mrb[21].mxu1  ;;  %1106 = vpow2.f32 %v947_v5  ;;  %v711_v21 = vadd.f32 %v1074_v8, %v1336_v60 }
 0x37d   :  { %v703_v10 = vadd.f32 %v1336_v60, %v702_v9  ;;  %v1075_v12 = vpop.f32.mrb[22].mxu1  ;;  %1108 = vpow2.f32 %v948_v11 }
 0x37e   :  { %v705_v13 = vpop.f32.mrb[23].mxu1  ;;  %v951_v27 = vmul.f32 -1.442695, %v711_v21  ;;  %v714_v28 = vadd.f32 %v1075_v12, %v1336_v60 }
 0x37f   :  { %v949_v14 = vmul.f32 -1.442695, %v703_v10  ;;  %v706_v15 = vadd.f32 %v1336_v60, %v705_v13 }
 0x380   :  { %v952_v33 = vmul.f32 -1.442695, %v714_v28 }
 0x381   :  { %1110 = vpow2.f32 %v949_v14  ;;  %v950_v22 = vmul.f32 -1.442695, %v706_v15 }
 0x383   :  { %v1103_v16 = vpop.eup %1102  ;;  %v1078_v17 = vpop.f32.mrb[24].mxu1 }
 0x384   :  { %v718_v18 = vpop.f32.mrb[25].mxu1  ;;  %v797_v19 = vadd.f32 1.0, %v1103_v16  ;;  %v727_v45 = vadd.f32 %v1078_v17, %v1336_v60 }
 0x385   :  { %v1105_v20 = vpop.eup %1104  ;;  %v1079_v23 = vpop.f32.mrb[26].mxu1  ;;  %v719_v34 = vadd.f32 %v1336_v60, %v718_v18 }
 0x386   :  { %v798_v24 = vadd.f32 1.0, %v1105_v20  ;;  %v721_v25 = vpop.f32.mrb[27].mxu1  ;;  %1112 = vrcp.f32 %v797_v19  ;;  %v1107_v26 = vpop.eup %1106  ;;  %v955_v50 = vmul.f32 -1.442695, %v727_v45  ;;  %v730_v51 = vadd.f32 %v1079_v23, %v1336_v60 }
 0x387   :  { %1114 = vpow2.f32 %v950_v22  ;;  %v799_v29 = vadd.f32 1.0, %v1107_v26  ;;  %v1109_v30 = vpop.eup %1108  ;;  %v953_v40 = vmul.f32 -1.442695, %v719_v34  ;;  %v722_v41 = vadd.f32 %v1336_v60, %v721_v25 }
 0x388   :  { %1116 = vrcp.f32 %v798_v24  ;;  %v800_v36 = vadd.f32 1.0, %v1109_v30  ;;  %v956_v55 = vmul.f32 -1.442695, %v730_v51 }
 0x389   :  { %1118 = vpow2.f32 %v951_v27  ;;  %v954_v46 = vmul.f32 -1.442695, %v722_v41 }
 0x38a   :  { %1120 = vrcp.f32 %v799_v29 }
 0x38b   :  { %v1082_v31 = vpop.f32.mrb[28].mxu1  ;;  %v1111_v38 = vpop.eup %1110  ;;  %1122 = vpow2.f32 %v952_v33 }
 0x38c   :  { %v734_v32 = vpop.f32.mrb[29].mxu1  ;;  %1124 = vrcp.f32 %v800_v36  ;;  %v801_v42 = vadd.f32 1.0, %v1111_v38  ;;  %v743_v2 = vadd.f32 %v1082_v31, %v1336_v60 }
 0x38d   :  { %v1083_v35 = vpop.f32.mrb[30].mxu1  ;;  %1126 = vpow2.f32 %v953_v40  ;;  %v735_v56 = vadd.f32 %v1336_v60, %v734_v32 }
 0x38e   :  { %v737_v37 = vpop.f32.mrb[31].mxu1  ;;  %1128 = vrcp.f32 %v801_v42  ;;  %v959_v7 = vmul.f32 -1.442695, %v743_v2  ;;  %v746_v8 = vadd.f32 %v1083_v35, %v1336_v60 }
 0x38f   :  { %1130 = vpow2.f32 %v954_v46  ;;  %v957_v61 = vmul.f32 -1.442695, %v735_v56  ;;  %v738_v62 = vadd.f32 %v1336_v60, %v737_v37 }
 0x390   :  { %v1113_v39 = vpop.eup %1112  ;;  %v960_v12 = vmul.f32 -1.442695, %v746_v8 }
 0x391   :  { %845 = vxpose.xlu0.b32.start [1/16] (narrow) %v1113_v39, 8  ;;  %v1115_v43 = vpop.eup %1114  ;;  %v958_v3 = vmul.f32 -1.442695, %v738_v62 }
 0x392   :  { %v1117_v44 = vpop.eup %1116  ;;  %v802_v47 = vadd.f32 1.0, %v1115_v43 }
 0x393   :  { %v1119_v48 = vpop.eup %1118 }
 0x394   :  { %v1121_v49 = vpop.eup %1120  ;;  %v803_v52 = vadd.f32 1.0, %v1119_v48  ;;  %1132 = vrcp.f32 %v802_v47 }
 0x395   :  { %846 = vxpose.xlu0.b32.cont [2/16] (narrow) %v1117_v44, 8  ;;  %v1123_v53 = vpop.eup %1122  ;;  %1134 = vpow2.f32 %v955_v50 }
 0x396   :  { %v1125_v54 = vpop.eup %1124  ;;  %1136 = vrcp.f32 %v803_v52  ;;  %v804_v57 = vadd.f32 1.0, %v1123_v53 }
 0x397   :  { %v1127_v58 = vpop.eup %1126  ;;  %1138 = vpow2.f32 %v956_v55 }
 0x398   :  { %v1129_v59 = vpop.eup %1128  ;;  %1140 = vrcp.f32 %v804_v57  ;;  %v805_v63 = vadd.f32 1.0, %v1127_v58 }
 0x399   :  { %847 = vxpose.xlu0.b32.cont [3/16] (narrow) %v1121_v49, 8  ;;  %v1131_v0 = vpop.eup %1130  ;;  %1142 = vpow2.f32 %v957_v61 }
 0x39a   :  { %1144 = vrcp.f32 %v805_v63  ;;  %v806_v4 = vadd.f32 1.0, %v1131_v0 }
 0x39b   :  { %1146 = vpow2.f32 %v958_v3 }
 0x39c   :  { %1148 = vrcp.f32 %v806_v4 }
 0x39d   :  { %848 = vxpose.xlu0.b32.cont [4/16] (narrow) %v1125_v54, 8  ;;  %1150 = vpow2.f32 %v959_v7 }
 0x39e   :  { %v1133_v1 = vpop.eup %1132 }
 0x39f   :  { %v1135_v5 = vpop.eup %1134 }
 0x3a0   :  { %v1137_v6 = vpop.eup %1136  ;;  %v807_v9 = vadd.f32 1.0, %v1135_v5 }
 0x3a1   :  { %849 = vxpose.xlu0.b32.cont [5/16] (narrow) %v1129_v59, 8  ;;  %v1139_v11 = vpop.eup %1138 }
 0x3a2   :  { %v1141_v10 = vpop.eup %1140  ;;  %1152 = vrcp.f32 %v807_v9  ;;  %v808_v13 = vadd.f32 1.0, %v1139_v11 }
 0x3a3   :  { %v1143_v14 = vpop.eup %1142  ;;  %1154 = vpow2.f32 %v960_v12 }
 0x3a4   :  { %v1145_v15 = vpop.eup %1144  ;;  %1156 = vrcp.f32 %v808_v13  ;;  %v809_v16 = vadd.f32 1.0, %v1143_v14 }
 0x3a5   :  { %850 = vxpose.xlu0.b32.cont [6/16] (narrow) %v1133_v1, 8  ;;  %v1147_v17 = vpop.eup %1146 }
 0x3a6   :  { %v1149_v18 = vpop.eup %1148  ;;  %1158 = vrcp.f32 %v809_v16  ;;  %v810_v60 = vadd.f32 1.0, %v1147_v17 }
 0x3a7   :  { %v1151_v19 = vpop.eup %1150 }
 0x3a8   :  { %v811_v21 = vadd.f32 1.0, %v1151_v19  ;;  %1160 = vrcp.f32 %v810_v60 }
 0x3a9   :  { %851 = vxpose.xlu0.b32.cont [7/16] (narrow) %v1137_v6, 8 }
 0x3aa   :  { %1162 = vrcp.f32 %v811_v21 }
 0x3ac   :  { %v1153_v20 = vpop.eup %1152 }
 0x3ad   :  { %852 = vxpose.xlu0.b32.cont [8/16] (narrow) %v1141_v10, 8  ;;  %v1155_v22 = vpop.eup %1154 }
 0x3ae   :  { %v1157_v23 = vpop.eup %1156  ;;  %v812_v24 = vadd.f32 1.0, %v1155_v22 }
 0x3b0   :  { %v1159_v25 = vpop.eup %1158  ;;  %1164 = vrcp.f32 %v812_v24 }
 0x3b1   :  { %853 = vxpose.xlu0.b32.cont [9/16] (narrow) %v1145_v15, 8 }
 0x3b2   :  { %v1161_v26 = vpop.eup %1160 }
 0x3b4   :  { %v1163_v27 = vpop.eup %1162 }
 0x3b5   :  { %854 = vxpose.xlu0.b32.cont [10/16] (narrow) %v1149_v18, 8 }
 0x3b9   :  { %855 = vxpose.xlu0.b32.cont [11/16] (narrow) %v1153_v20, 8 }
 0x3ba   :  { %v1165_v28 = vpop.eup %1164 }
 0x3bd   :  { %856 = vxpose.xlu0.b32.cont [12/16] (narrow) %v1157_v23, 8 }
 0x3c1   :  { %857 = vxpose.xlu0.b32.cont [13/16] (narrow) %v1159_v25, 8 }
 0x3c5   :  { %858 = vxpose.xlu0.b32.cont [14/16] (narrow) %v1161_v26, 8 }
 0x3c9   :  { %859 = vxpose.xlu0.b32.cont [15/16] (narrow) %v1163_v27, 8 }
 0x3cd   :  { %860 = vxpose.xlu0.b32.end [16/16] (narrow) %v1165_v28, 8 }
 0x411   :  { %v861_v29 = vpop.trf.xlu0 }
 0x412   :  { %877 = vst [vmem:[#allocation2] sm:$0x3] %v861_v29 }
 0x413   :  { %1177 = shalt.err (!%p1174_p4)
}
 0x414   :  { %s1178_s25 = scalar_lea.hbm %s1375_s9, 32 }
 0x415   :  { %p1179_p5 = scmp.ne.s32.totalorder %s1375_s9, %s1178_s25  ;;  %p1182_p6 = scmp.lt.u32.totalorder %s1178_s25, %s1375_s9 }
 0x417   :  { %p1184_p7 = pnand %p1182_p6, %p1179_p5 }
 0x419   :  { %1187 = shalt.err (!%p1184_p7)
}
 0x41a   :  { %887 = dma.vmem_to_hbm [thread:$0]  %s885_s21, 32, %s1375_s9, [#allocation3]  }
 0x41b   :  { %1188 = dma.done.wait [#allocation3], 32  }
 0x41c   :  { %1189 = vsyncadd [#allocation3], 4294967264 }
 0x41d   :  { %891 = vsyncpa [#allocation3], 1 }

</bundles_post_ra>
